<compile_context>
chip_gen: v5e
topology: v5e:2x2
jax: 0.10.0
libtpu: 0.0.40
codegen_flags: <defaults>
</compile_context>

<pallas_src>
import jax
import jax.numpy as jnp
from jax import lax
from jax.experimental import pallas as pl
from jax.experimental.pallas import tpu as pltpu


_SLAB_ORDER = ((0, 0), (1, 0), (0, 1), (1, 1))  # (h-parity, w-parity), PyTorch cat order


def _s2d_kernel(x_ref, o_ref):
    # x_ref: (TH, 2, W2, 2C)  -> [row, h-parity, w2, (w-parity x C)]
    # o_ref: (TH, W2, 4C)
    C = o_ref.shape[-1] // 4
    TH = o_ref.shape[0]

    if C % 128 == 0:
        # Lane-aligned fast path: every slab copy is a full-width, unmasked,
        # zero-lane-offset move (128-lane aligned slices).
        for k, (rh, rw) in enumerate(_SLAB_ORDER):
            o_ref[:, :, k * C:(k + 1) * C] = x_ref[:, rh, :, rw * C:(rw + 1) * C]
    else:
        # General path (SlimNeck C=32/64): compose each output row in vregs and
        # issue a single full-width store per row. The lane placement of the
        # four C-wide slabs is expressed as a lane concatenate, which Mosaic
        # lowers to XLU shifts + selects -- off the (scarce) vector-store slot.
        def body(r, carry):
            x = x_ref[r]                                   # (2, W2, 2C)
            o_ref[r] = jnp.concatenate(
                [x[rh, :, rw * C:(rw + 1) * C] for (rh, rw) in _SLAB_ORDER],
                axis=-1)                                   # (W2, 4C), one store
            return carry

        lax.fori_loop(0, TH, body, 0)


def _tile_plan(num_rows, row_bytes):
    """Generation-aware (tile_rows, grid_steps, vmem_limit_bytes)."""
    try:
        vmem_cap = int(pltpu.get_tpu_info().vmem_capacity_bytes)
    except Exception:
        vmem_cap = 64 << 20  # conservative: assume the small-VMEM generation

    if vmem_cap >= (100 << 20):
        # v5e / v6e: 128 MiB physical VMEM -> big blocks, fewer steps.
        target_block, vmem_limit, hard_cap, min_steps = 8 << 20, 64 << 20, 96 << 20, 8
    else:
        # v7x: 64 MiB physical VMEM, 2 TensorCores -> smaller blocks, >=8 steps/TC.
        target_block, vmem_limit, hard_cap, min_steps = 4 << 20, 48 << 20, 56 << 20, 16

    th = max(1, min(num_rows, target_block // max(row_bytes, 1)))
    if num_rows >= min_steps:
        th = max(1, min(th, num_rows // min_steps))  # keep pipeline / per-core depth
    steps = pl.cdiv(num_rows, th)

    block_bytes = th * row_bytes
    # in + out blocks, double-buffered (= 4x block), plus headroom.
    vmem_limit = int(min(max(vmem_limit, 4 * block_bytes + (2 << 20)), hard_cap))
    return th, steps, vmem_limit


def space_to_depth_nhwc(x_nhwc):
    """2x2 space-to-depth, NHWC in / NHWC out: (N,H,W,C) -> (N,H/2,W/2,4C)."""
    N, H, W, C = x_nhwc.shape
    assert H % 2 == 0 and W % 2 == 0, "spatial dims must be even"
    H2, W2 = H // 2, W // 2
    itemsize = jnp.dtype(x_nhwc.dtype).itemsize

    R = N * H2                          # flattened, fully independent output rows
    row_bytes = 2 * W * C * itemsize    # one output row == one input row-pair
    TH, steps, vmem_limit = _tile_plan(R, row_bytes)

    # Free reshape: h-parity becomes a major dim, w-parity a lane slice.
    x_r = x_nhwc.reshape(R, 2, W2, 2 * C)

    out_flat = pl.pallas_call(
        _s2d_kernel,
        out_shape=jax.ShapeDtypeStruct((R, W2, 4 * C), x_nhwc.dtype),
        grid=(steps,),
        in_specs=[pl.BlockSpec((TH, 2, W2, 2 * C), lambda r: (r, 0, 0, 0))],
        out_specs=pl.BlockSpec((TH, W2, 4 * C), lambda r: (r, 0, 0)),
        compiler_params=pltpu.CompilerParams(
            dimension_semantics=("parallel",),
            vmem_limit_bytes=vmem_limit),
        cost_estimate=pl.CostEstimate(
            flops=0,
            transcendentals=0,
            bytes_accessed=int(2 * N * H * W * C * itemsize)),
    )(x_r)

    return out_flat.reshape(N, H2, W2, 4 * C)  # free reshape


def space_to_depth(x_nchw):
    """Matches `space_to_depth().forward(x)` for NCHW input -> NCHW output."""
    # Boundary layout glue only (honors the PyTorch NCHW contract). NHWC callers
    # should use `space_to_depth_nhwc` directly and avoid both transposes.
    # TODO(synk): fuse the NCHW->NHWC permutation into the kernel (grid over
    # channel groups) to cut end-to-end HBM traffic for NCHW callers.
    x_nhwc = jnp.transpose(x_nchw, (0, 2, 3, 1))
    out_nhwc = space_to_depth_nhwc(x_nhwc)
    return jnp.transpose(out_nhwc, (0, 3, 1, 2))


def _reference(x_nchw):
    return jnp.concatenate(
        [
            x_nchw[..., ::2, ::2],
            x_nchw[..., 1::2, ::2],
            x_nchw[..., ::2, 1::2],
            x_nchw[..., 1::2, 1::2],
        ],
        axis=1,
    )


if __name__ == "__main__":
    key = jax.random.PRNGKey(0)
    x = jax.random.normal(key, (2, 4, 16, 16), dtype=jnp.float32)  # NCHW

    out = jax.block_until_ready(space_to_depth(x))

    ref = _reference(x)
    assert out.shape == (2, 16, 8, 8), out.shape
    assert jnp.array_equal(out, ref), "mismatch vs pure-JAX reference"

    print("KERNEL_OK")
</pallas_src>

<mosaic_0001>
module attributes {stable_mosaic.version = 11 : i64} {
  func.func @_s2d_kernel(%arg0: i32, %arg1: memref<1x2x8x8xf32, #tpu.memory_space<vmem>>, %arg2: memref<1x8x16xf32, #tpu.memory_space<vmem>>) attributes {dimension_semantics = [#tpu.dimension_semantics<parallel>], iteration_bounds = array<i64: 16>, scalar_prefetch = 0 : i64, scratch_operands = 0 : i64, tpu.core_type = #tpu.core_type<tc>, window_params = [{transform_indices = @transform_0, window_bounds = array<i64: 1, 2, 8, 8>}, {transform_indices = @transform_1, window_bounds = array<i64: 1, 8, 16>}]} {
    %c0_i32 = arith.constant 0 : i32
    %0 = arith.index_cast %c0_i32 : i32 to index
    %c0 = arith.constant 0 : index
    %c0_0 = arith.constant 0 : index
    %c0_1 = arith.constant 0 : index
    %1 = vector.load %arg1[%0, %c0, %c0_0, %c0_1] : memref<1x2x8x8xf32, #tpu.memory_space<vmem>>, vector<1x2x8x8xf32>
    %2 = vector.shape_cast %1 : vector<1x2x8x8xf32> to vector<2x8x8xf32>
    %3 = vector.extract_strided_slice %2 {offsets = [0, 0, 0], sizes = [1, 8, 4], strides = [1, 1, 1]} : vector<2x8x8xf32> to vector<1x8x4xf32>
    %4 = vector.shape_cast %3 : vector<1x8x4xf32> to vector<8x4xf32>
    %5 = vector.extract_strided_slice %2 {offsets = [1, 0, 0], sizes = [1, 8, 4], strides = [1, 1, 1]} : vector<2x8x8xf32> to vector<1x8x4xf32>
    %6 = vector.shape_cast %5 : vector<1x8x4xf32> to vector<8x4xf32>
    %7 = vector.extract_strided_slice %2 {offsets = [0, 0, 4], sizes = [1, 8, 4], strides = [1, 1, 1]} : vector<2x8x8xf32> to vector<1x8x4xf32>
    %8 = vector.shape_cast %7 : vector<1x8x4xf32> to vector<8x4xf32>
    %9 = vector.extract_strided_slice %2 {offsets = [1, 0, 4], sizes = [1, 8, 4], strides = [1, 1, 1]} : vector<2x8x8xf32> to vector<1x8x4xf32>
    %10 = vector.shape_cast %9 : vector<1x8x4xf32> to vector<8x4xf32>
    %11 = tpu.concatenate %4, %6, %8, %10 in 1 : vector<8x4xf32>, vector<8x4xf32>, vector<8x4xf32>, vector<8x4xf32> -> vector<8x16xf32>
    %12 = arith.index_cast %c0_i32 : i32 to index
    %c0_2 = arith.constant 0 : index
    %c0_3 = arith.constant 0 : index
    %13 = vector.load %arg2[%12, %c0_2, %c0_3] : memref<1x8x16xf32, #tpu.memory_space<vmem>>, vector<1x8x16xf32>
    %14 = vector.shape_cast %13 : vector<1x8x16xf32> to vector<8x16xf32>
    %15 = vector.shape_cast %11 : vector<8x16xf32> to vector<1x8x16xf32>
    tpu.vector_store %arg2[%12, %c0_2, %c0_3], %15 {strides = array<i32>} : memref<1x8x16xf32, #tpu.memory_space<vmem>>, vector<1x8x16xf32>,
    %c1_i32 = arith.constant 1 : i32
    return
  }
  func.func @transform_0(%arg0: i32) -> (i32, i32, i32, i32) {
    %c0_i32 = arith.constant 0 : i32
    %c0_i32_0 = arith.constant 0 : i32
    %c0_i32_1 = arith.constant 0 : i32
    %c0_i32_2 = arith.constant 0 : i32
    return %arg0, %c0_i32, %c0_i32_0, %c0_i32_1 : i32, i32, i32, i32
  }
  func.func @transform_1(%arg0: i32) -> (i32, i32, i32) {
    %c0_i32 = arith.constant 0 : i32
    %c0_i32_0 = arith.constant 0 : i32
    %c0_i32_1 = arith.constant 0 : i32
    return %arg0, %c0_i32, %c0_i32_0 : i32, i32, i32
  }
}

</mosaic_0001>

<bundles_post_ra>
// kernel: tpu_custom_call.1
= control target key start
LH: loop header
LB: loop body
LE: loop exit
PB: predicated region body
PF: predicated region fallthrough
CT: control target
= control target key end

     0   :  { %6 = vsyncpa [#allocation3], 0  ;;  %s425_s0 = inlined_call_operand.vmem [shape: f32[16,2,8,8], index: 0, kind: input, shape index: {}]   ;;  %s426_s1 = inlined_call_operand.hbm [shape: f32[16,8,16], index: 1, kind: output, shape index: {}]  }
   0x1   :  { %8 = vsyncpa [#allocation3 + $0x1], 0  ;;  %s340_s6 = smov 0   ;;  %s342_s7 = smov 0  }
   0x2   :  { %s344_s8 = smov 0   ;;  %s346_s9 = smov 0  }
   0x3 LB: > { %s361_s10 = sadd.s32 4294967295, %s326_s9   ;;  %s211_s11 = sadd.s32 4294967294, %s326_s9   ;;  %s326_s9 = sphi %s346_s9, %s432_s9   ;;  %s322_s8 = sphi %s344_s8, %s431_s8   ;;  %s318_s7 = sphi %s342_s7, %s430_s7   ;;  %s314_s6 = sphi %s340_s6, %s429_s6  }
   0x4   : > { %s365_s12 = sadd.s32 1, %s326_s9   ;;  %s47_s13 = sadd.s32 1, %s322_s8 }
   0x5   : > { %s44_s14 = ssub.s32 %s326_s9, %s365_s12  ;;  %p57_p0 = scmp.ne.s32.totalorder %s322_s8, %s318_s7 }
   0x6   : > { %p45_p1 = scmp.eq.s32.totalorder %s44_s14, 0  ;;  %p58_p2 = scmp.eq.s32.totalorder %s361_s10, 15 }
   0x7   : > { %p63_p3 = scmp.ne.s32.totalorder %s318_s7, %s314_s6  ;;  %p64_p4 = scmp.eq.s32.totalorder %s211_s11, 15 }
   0x8   : > { %s376_s15 = scalar_select %p45_p1, %s322_s8, %s47_s13  }
   0x9   : > { %p378_p5 = por %p58_p2, %p57_p0  ;;  %p382_p6 = por %p64_p4, %p63_p3 }
   0xa   : > { %p214_p7 = scmp.ge.s32.totalorder %s326_s9, 1  ;;  %p90_p8 = scmp.lt.s32.totalorder %s326_s9, 17 }
   0xc   : > { %p91_p9 = pnand %p214_p7, %p90_p8 }
   0xd   : > { %p110_p10 = scmp.lt.s32.totalorder (!%p91_p9), %s361_s10, 15  ;;  %s328_s23 = smov (!%p91_p9), 4  }
   0xe   : > { %94 = sbr.rel (%p91_p9) target bundleno = 152 (0x98), region = 24  ;;  %s329_s24 = smov (!%p91_p9), 8  }
   0xf   : > { %s107_s25 = sand.u32 (!%p91_p9), 1, %s318_s7   ;;  %s219_s27 = sshll.u32 (!%p91_p9), %s361_s10, 3 }
  0x10   : > { %s215_s26 = sshll.u32 (!%p91_p9), %s107_s25, 3  ;;  %s147_s30 = scalar_lea.hbm (!%p91_p9), %s426_s1, %s219_s27 }
  0x11   : > { %s109_s2 = scalar_lea.vmem (!%p91_p9), [#allocation2], %s215_s26  ;;  %s151_s4 = sshll.u32 (!%p91_p9), %s147_s30, 4  ;;  %s152_s4 = int_to_ptr.hbm [resolvable:$true] %s151_s4 }
  0x12   : > { %s149_s3 = sshll.u32 (!%p91_p9), %s109_s2, 4  ;;  %s137_s5 = scalar_lea.sflag (!%p91_p9), [#allocation3], %s107_s25  ;;  %s150_s3 = int_to_ptr.vmem [resolvable:$true] %s149_s3 }
  0x13   : > { %s111_s18 = scalar_select %p110_p10, %s361_s10, 15  ;;  %vm128_vm0 = vcmask 31744   ;;  %vm130_vm1 = vcmask 64512   ;;  %vm132_vm2 = vcmask 97280   ;;  %vm134_vm3 = vcmask 130048  }
  0x14   : > { %s278_s10 = sshra.s32 %s152_s4, 4  ;;  %s279_s10 = int_to_ptr.hbm [resolvable:$true] %s278_s10 }
  0x15   : > { %s222_s19 = sshll.u32 %s111_s18, 4  ;;  %s280_s11 = scalar_lea.hbm %s279_s10, 8 }
  0x16   : > { %s114_s22 = scalar_lea.vmem %s425_s0, %s222_s19  ;;  %p281_p11 = scmp.ne.s32.totalorder %s279_s10, %s280_s11 }
  0x17   : > { %v116_v0 = vld [vmem:[%s114_s22 + $0x8] sm:$0xff]  ;;  %v115_v1 = vld [vmem:[%s114_s22] sm:$0xff]  ;;  %s284_s18 = scalar_lea.hbm %s426_s1, 128  ;;  %p285_p0 = scmp.lt.s32.totalorder %s279_s10, %s426_s1 }
  0x18   : > { %118 = vrot.lane.b32.xlu0 %v116_v0, %s328_s23  ;;  %125 = vrot.lane.b32.xlu1 %v116_v0, %s329_s24  ;;  %p282_p12 = pnand %p281_p11, %p378_p5  ;;  %p286_p1 = scmp.lt.s32.totalorder %s284_s18, %s280_s11 }
  0x1a   : > { %p283_p13 = pneg %p282_p12  ;;  %p287_p2 = por %p286_p1, %p285_p0 }
  0x1c   : > { %p288_p3 = pnand %p287_p2, %p283_p13 }
  0x20   : > { %122 = vrot.lane.b32.xlu0 %v115_v1, %s328_s23 }
  0x8a   : > { %v119_v2 = vpop.permute.xlu0 %118  ;;  %v126_v3 = vpop.permute.xlu1 %125 }
  0x8b   : > { %v129_v4 = vsel %vm128_vm0, %v115_v1, %v119_v2 }
  0x92   : > { %v123_v5 = vpop.permute.xlu0 %122 }
  0x93   : > { %v131_v6 = vsel %vm130_vm1, %v129_v4, %v123_v5 }
  0x94   : > { %v133_v7 = vsel %vm132_vm2, %v131_v6, %v126_v3 }
  0x95   : > { %135 = vst.msk [vmem:[%s109_s2] sm:$0xff] %vm134_vm3, %v133_v7 }
  0x96   : > { %291 = shalt.err (!%p288_p3)
}
  0x97   : > { %223 = dma.vmem_to_hbm [thread:$0]  (%p378_p5), %s150_s3, 128, %s152_s4, %s137_s5  }
  0x98 PF: > { %p229_p4 = scmp.ge.s32.totalorder %s326_s9, 2  ;;  %s163_s21 = sand.u32 1, %s314_s6  }
  0x99   : > { %s164_s22 = scalar_lea.sflag [#allocation3], %s163_s21 }
  0x9a   : > { %p226_p7 = pnand %p229_p4, %p382_p6 }
  0x9c   : > { %p227_p8 = pneg %p226_p7 }
  0x9e   : > { %309 = dma.done.wait (%p227_p8), %s164_s22, 128  }
  0x9f   : > { %311 = vsyncadd (%p227_p8), %s164_s22, 4294967168  ;;  %p11_p9 = scmp.ge.s32.totalorder %s365_s12, 18   ;;  %s429_s6 = smov %s318_s7 }
  0xa0   : > { %s430_s7 = smov %s322_s8  ;;  %s431_s8 = smov %s376_s15 }
  0xa1   : > { %s432_s9 = smov %s365_s12  ;;  %13 = sbr.rel (!%p11_p9) target bundleno = 3 (0x3), region = 59 }
  0xa6   :  { %170 = vsyncpa [#allocation3], 1 }
  0xa7   :  { %172 = vsyncpa [#allocation3 + $0x1], 1 }

</bundles_post_ra>
